<compile_context>
chip_gen: v7x
topology: tpu7x:2x2x1
jax: 0.10.0
libtpu: 0.0.40
codegen_flags: <defaults>
</compile_context>

<pallas_src>
import functools
import math

import jax
import jax.numpy as jnp
from jax.experimental import pallas as pl
from jax.experimental.pallas import tpu as pltpu


_CompilerParams = getattr(pltpu, "CompilerParams", None) or getattr(
    pltpu, "TPUCompilerParams", None)


def _round_up(a, b):
    return pl.cdiv(a, b) * b


def _vmem_limit_bytes():
    """Per-chip VMEM cap: ~56 MiB on v7x (64 MiB physical), ~100 MiB on v5e/v6e."""
    try:
        cap = pltpu.get_tpu_info().vmem_capacity_bytes
    except Exception:  # query unavailable -> conservative value, safe on every chip
        cap = 64 * 1024 * 1024
    return int(min(cap * 7 // 8, 100 * 1024 * 1024))


def _resident_spec(shape):
    """Constant-index (never re-fetched) block; single-buffered when supported."""
    index_map = lambda b, qi: (0,) * len(shape)
    if hasattr(pl, "Buffered"):
        try:
            return pl.BlockSpec(shape, index_map, pipeline_mode=pl.Buffered(1))
        except Exception:
            pass
    return pl.BlockSpec(shape, index_map)


def mha_kernel(xq_ref, xkv_ref, wq_ref, bq_ref, wk_ref, bk_ref, wv_ref, bv_ref,
               wo_ref, bo_ref, gamma_ref, beta_ref, out_ref,
               k_scratch, v_scratch, *, num_heads, d_k, eps, seq_len):
    kv_len = k_scratch.shape[1]                     # padded sequence length (static)

    # ---- K/V projections: once per batch (q-tile 0), reused by all q-tiles ----
    @pl.when(pl.program_id(1) == 0)
    def _():
        xkv = xkv_ref[...]                          # (S_pad, D) bf16 (cast on host)
        k = jnp.dot(xkv, wk_ref[...], preferred_element_type=jnp.float32) + bk_ref[...]
        v = jnp.dot(xkv, wv_ref[...], preferred_element_type=jnp.float32) + bv_ref[...]
        k = k.astype(jnp.bfloat16)
        v = v.astype(jnp.bfloat16)
        # Head split into head-major scratch; amortised over all q-tiles.
        # TODO(synk): single pltpu.einshape relayout when d_k is lane-aligned.
        for h in range(num_heads):
            k_scratch[h] = k[:, h * d_k:(h + 1) * d_k]
            v_scratch[h] = v[:, h * d_k:(h + 1) * d_k]

    xq = xq_ref[...]                                # (TQ, D) f32, kept for residual/LN
    xq_bf = xq.astype(jnp.bfloat16)

    # Q projection (1/sqrt(d_k) already folded into wq/bq on the host).
    q = jnp.dot(xq_bf, wq_ref[...], preferred_element_type=jnp.float32) + bq_ref[...]
    q = q.astype(jnp.bfloat16)
    q3 = jnp.stack([q[:, h * d_k:(h + 1) * d_k] for h in range(num_heads)], axis=0)

    k3 = k_scratch[...]                             # (H, S_pad, d_k) bf16
    v3 = v_scratch[...]

    # Batched per-head scores; contraction on the last dim of both operands.
    scores = jnp.einsum('hqd,hkd->hqk', q3, k3,
                        preferred_element_type=jnp.float32)   # (H, TQ, S_pad) f32

    if seq_len < kv_len:                            # static: mask padded key rows
        kidx = jax.lax.broadcasted_iota(jnp.int32, scores.shape, 2)
        scores = jnp.where(kidx < seq_len, scores, jnp.float32(-1e9))
    # TODO(synk): user-supplied mask (masked_fill(mask == 0, -1e9)) not implemented.

    # Softmax (fp32), exact normalisation applied after the PV matmul.
    m = jnp.max(scores, axis=-1, keepdims=True)
    p = jnp.exp(scores - m)
    l = jnp.sum(p, axis=-1, keepdims=True)                     # (H, TQ, 1)
    o = jnp.einsum('hqk,hkd->hqd', p.astype(jnp.bfloat16), v3,
                   preferred_element_type=jnp.float32)         # (H, TQ, d_k)
    o = (o / l).astype(jnp.bfloat16)

    # Merge heads back onto the lane axis, one full-width output GEMM (depth D).
    attn = jnp.concatenate([o[h] for h in range(num_heads)], axis=-1)   # (TQ, D)
    proj = jnp.dot(attn, wo_ref[...], preferred_element_type=jnp.float32) + bo_ref[...]

    # Residual + LayerNorm (fp32, two-pass variance).
    y = xq + proj
    mean = jnp.mean(y, axis=-1, keepdims=True)
    yc = y - mean
    var = jnp.mean(yc * yc, axis=-1, keepdims=True)
    out_ref[...] = yc * jax.lax.rsqrt(var + eps) * gamma_ref[...] + beta_ref[...]


def multi_head_attention(x, params, *, num_heads, eps=1e-5, q_block=128):
    """Fused MHA + residual + LayerNorm forward (dropout = identity / eval mode)."""
    B, S, D = x.shape
    assert D % num_heads == 0
    d_k = D // num_heads
    wq, bq, wk, bk, wv, bv, wo, bo, gamma, beta = params

    # Host-side prep: fold the score scale into the Q projection, cast GEMM
    # weights to bf16 (MXU native); biases / LN params stay f32.
    scale = 1.0 / math.sqrt(d_k)
    wq_b = (wq * scale).astype(jnp.bfloat16)
    bq_s = (jnp.asarray(bq, jnp.float32) * scale).reshape(1, D)
    wk_b = wk.astype(jnp.bfloat16)
    wv_b = wv.astype(jnp.bfloat16)
    wo_b = wo.astype(jnp.bfloat16)
    bk_f = jnp.asarray(bk, jnp.float32).reshape(1, D)
    bv_f = jnp.asarray(bv, jnp.float32).reshape(1, D)
    bo_f = jnp.asarray(bo, jnp.float32).reshape(1, D)
    gamma_f = jnp.asarray(gamma, jnp.float32).reshape(1, D)
    beta_f = jnp.asarray(beta, jnp.float32).reshape(1, D)

    # Query tiling with padding (never fall back to a full-sequence tile).
    TQ = _round_up(min(q_block, _round_up(S, 8)), 8)
    S_pad = _round_up(S, TQ)
    x_pad = jnp.pad(x, ((0, 0), (0, S_pad - S), (0, 0))) if S_pad != S else x
    x_kv = x_pad.astype(jnp.bfloat16)       # K/V-path input fed as bf16 from the host

    grid = (B, S_pad // TQ)
    kernel = functools.partial(mha_kernel, num_heads=num_heads, d_k=d_k,
                               eps=eps, seq_len=S)

    w_spec = _resident_spec((D, D))
    vec_spec = _resident_spec((1, D))

    out = pl.pallas_call(
        kernel,
        out_shape=jax.ShapeDtypeStruct((B, S_pad, D), jnp.float32),
        grid_spec=pltpu.PrefetchScalarGridSpec(
            num_scalar_prefetch=0,
            grid=grid,
            in_specs=[
                pl.BlockSpec((None, TQ, D), lambda b, qi: (b, qi, 0)),    # x (f32): query rows
                pl.BlockSpec((None, S_pad, D), lambda b, qi: (b, 0, 0)),  # x (bf16): full seq (K/V)
                w_spec, vec_spec,    # w_q (scaled, bf16), b_q (scaled, f32)
                w_spec, vec_spec,    # w_k, b_k
                w_spec, vec_spec,    # w_v, b_v
                w_spec, vec_spec,    # w_o, b_o
                vec_spec, vec_spec,  # gamma, beta
            ],
            out_specs=pl.BlockSpec((None, TQ, D), lambda b, qi: (b, qi, 0)),
            scratch_shapes=[
                pltpu.VMEM((num_heads, S_pad, d_k), jnp.bfloat16),  # K, head-major
                pltpu.VMEM((num_heads, S_pad, d_k), jnp.bfloat16),  # V, head-major
            ],
        ),
        compiler_params=_CompilerParams(
            dimension_semantics=("parallel", "arbitrary"),
            vmem_limit_bytes=_vmem_limit_bytes(),
        ),
    )(x_pad, x_kv, wq_b, bq_s, wk_b, bk_f, wv_b, bv_f, wo_b, bo_f, gamma_f, beta_f)

    return out[:, :S, :] if S_pad != S else out


def reference_mha(x, params, *, num_heads, eps=1e-5):
    """Pure-JAX fp32 reference mirroring the PyTorch forward (dropout = identity)."""
    wq, bq, wk, bk, wv, bv, wo, bo, gamma, beta = params
    B, S, D = x.shape
    d_k = D // num_heads

    def proj(w, b):
        return (x @ w + b.reshape(1, D)).reshape(B, S, num_heads, d_k).transpose(0, 2, 1, 3)

    Q, K, V = proj(wq, bq), proj(wk, bk), proj(wv, bv)
    scores = jnp.einsum('bhqd,bhkd->bhqk', Q, K) / math.sqrt(d_k)
    attn = jax.nn.softmax(scores, axis=-1)
    out = jnp.einsum('bhqk,bhkd->bhqd', attn, V)
    out = out.transpose(0, 2, 1, 3).reshape(B, S, D)
    out = out @ wo + bo.reshape(1, D)
    y = x + out
    mean = jnp.mean(y, axis=-1, keepdims=True)
    var = jnp.mean((y - mean) ** 2, axis=-1, keepdims=True)
    return (y - mean) / jnp.sqrt(var + eps) * gamma.reshape(1, D) + beta.reshape(1, D)


if __name__ == "__main__":
    B, S, D, H = 2, 8, 32, 4

    key = jax.random.PRNGKey(0)
    keys = jax.random.split(key, 9)
    x = jax.random.normal(keys[0], (B, S, D), jnp.float32)

    std = 1.0 / math.sqrt(D)
    wq = jax.random.normal(keys[1], (D, D), jnp.float32) * std
    wk = jax.random.normal(keys[2], (D, D), jnp.float32) * std
    wv = jax.random.normal(keys[3], (D, D), jnp.float32) * std
    wo = jax.random.normal(keys[4], (D, D), jnp.float32) * std
    bq = jax.random.normal(keys[5], (1, D), jnp.float32) * std
    bk = jax.random.normal(keys[6], (1, D), jnp.float32) * std
    bv = jax.random.normal(keys[7], (1, D), jnp.float32) * std
    bo = jax.random.normal(keys[8], (1, D), jnp.float32) * std
    gamma = jnp.ones((1, D), jnp.float32)
    beta = jnp.zeros((1, D), jnp.float32)
    params = (wq, bq, wk, bk, wv, bv, wo, bo, gamma, beta)

    # Case 1: S is a multiple of the tile (single q-tile per batch).
    out = jax.block_until_ready(multi_head_attention(x, params, num_heads=H))
    ref = reference_mha(x, params, num_heads=H)
    assert out.shape == (B, S, D)
    # bf16 matmul inputs with fp32 accumulation -> looser tolerance vs fp32 ref.
    assert jnp.allclose(out, ref, atol=5e-2, rtol=5e-2), "mismatch vs reference (single tile)"

    # Case 2: S not a multiple of the tile -> padding + key masking + two
    # q-tiles per batch (exercises the once-per-batch K/V scratch reuse).
    S2 = 12
    x2 = jax.random.normal(jax.random.PRNGKey(1), (B, S2, D), jnp.float32)
    out2 = jax.block_until_ready(multi_head_attention(x2, params, num_heads=H, q_block=8))
    ref2 = reference_mha(x2, params, num_heads=H)
    assert out2.shape == (B, S2, D)
    assert jnp.allclose(out2, ref2, atol=5e-2, rtol=5e-2), "mismatch vs reference (tiled+padded)"

    print("KERNEL_OK")
</pallas_src>

<mosaic_0001>
module attributes {stable_mosaic.version = 11 : i64} {
  func.func @mha_kernel(%arg0: i32, %arg1: i32, %arg2: memref<1x8x32xf32, #tpu.memory_space<vmem>>, %arg3: memref<1x8x32xbf16, #tpu.memory_space<vmem>>, %arg4: memref<32x32xbf16, #tpu.memory_space<vmem>>, %arg5: memref<1x32xf32, #tpu.memory_space<vmem>>, %arg6: memref<32x32xbf16, #tpu.memory_space<vmem>>, %arg7: memref<1x32xf32, #tpu.memory_space<vmem>>, %arg8: memref<32x32xbf16, #tpu.memory_space<vmem>>, %arg9: memref<1x32xf32, #tpu.memory_space<vmem>>, %arg10: memref<32x32xbf16, #tpu.memory_space<vmem>>, %arg11: memref<1x32xf32, #tpu.memory_space<vmem>>, %arg12: memref<1x32xf32, #tpu.memory_space<vmem>>, %arg13: memref<1x32xf32, #tpu.memory_space<vmem>>, %arg14: memref<1x8x32xf32, #tpu.memory_space<vmem>>, %arg15: memref<4x8x8xbf16, #tpu.memory_space<vmem>>, %arg16: memref<4x8x8xbf16, #tpu.memory_space<vmem>>) attributes {dimension_semantics = [#tpu.dimension_semantics<parallel>, #tpu.dimension_semantics<arbitrary>], iteration_bounds = array<i64: 2, 1>, scalar_prefetch = 0 : i64, scratch_operands = 2 : i64, tpu.core_type = #tpu.core_type<tc>, window_params = [{transform_indices = @transform_0, window_bounds = array<i64: 1, 8, 32>}, {transform_indices = @transform_1, window_bounds = array<i64: 1, 8, 32>}, {pipeline_mode = #tpu.pipeline_mode<synchronous>, transform_indices = @transform_2, window_bounds = array<i64: 32, 32>}, {pipeline_mode = #tpu.pipeline_mode<synchronous>, transform_indices = @transform_3, window_bounds = array<i64: 1, 32>}, {pipeline_mode = #tpu.pipeline_mode<synchronous>, transform_indices = @transform_4, window_bounds = array<i64: 32, 32>}, {pipeline_mode = #tpu.pipeline_mode<synchronous>, transform_indices = @transform_5, window_bounds = array<i64: 1, 32>}, {pipeline_mode = #tpu.pipeline_mode<synchronous>, transform_indices = @transform_6, window_bounds = array<i64: 32, 32>}, {pipeline_mode = #tpu.pipeline_mode<synchronous>, transform_indices = @transform_7, window_bounds = array<i64: 1, 32>}, {pipeline_mode = #tpu.pipeline_mode<synchronous>, transform_indices = @transform_8, window_bounds = array<i64: 32, 32>}, {pipeline_mode = #tpu.pipeline_mode<synchronous>, transform_indices = @transform_9, window_bounds = array<i64: 1, 32>}, {pipeline_mode = #tpu.pipeline_mode<synchronous>, transform_indices = @transform_10, window_bounds = array<i64: 1, 32>}, {pipeline_mode = #tpu.pipeline_mode<synchronous>, transform_indices = @transform_11, window_bounds = array<i64: 1, 32>}, {transform_indices = @transform_12, window_bounds = array<i64: 1, 8, 32>}]} {
    %c0_i32 = arith.constant 0 : i32
    %0 = arith.cmpi eq, %arg1, %c0_i32 : i32
    %1 = arith.extui %0 : i1 to i32
    %c0_i32_0 = arith.constant 0 : i32
    %2 = arith.cmpi ne, %1, %c0_i32_0 : i32
    scf.if %2 {
      %c0_34 = arith.constant 0 : index
      %c0_35 = arith.constant 0 : index
      %c0_36 = arith.constant 0 : index
      %76 = vector.load %arg3[%c0_34, %c0_35, %c0_36] : memref<1x8x32xbf16, #tpu.memory_space<vmem>>, vector<1x8x32xbf16>
      %77 = vector.shape_cast %76 : vector<1x8x32xbf16> to vector<8x32xbf16>
      %c0_37 = arith.constant 0 : index
      %c0_38 = arith.constant 0 : index
      %78 = vector.load %arg6[%c0_37, %c0_38] : memref<32x32xbf16, #tpu.memory_space<vmem>>, vector<32x32xbf16>
      %cst_39 = arith.constant dense<0.000000e+00> : vector<8x32xf32>
      %79 = tpu.matmul %77, %78, %cst_39 {dimension_numbers = #tpu.dot_dimension_numbers<[1], [0], [0], [1], [0, 0, 1, 1], [], []>} : vector<8x32xbf16>, vector<32x32xbf16>, vector<8x32xf32> -> vector<8x32xf32>
      %c0_40 = arith.constant 0 : index
      %c0_41 = arith.constant 0 : index
      %80 = vector.load %arg7[%c0_40, %c0_41] : memref<1x32xf32, #tpu.memory_space<vmem>>, vector<1x32xf32>
      %81 = vector.broadcast %80 : vector<1x32xf32> to vector<8x32xf32>
      %82 = arith.addf %79, %81 : vector<8x32xf32>
      %c0_42 = arith.constant 0 : index
      %c0_43 = arith.constant 0 : index
      %83 = vector.load %arg8[%c0_42, %c0_43] : memref<32x32xbf16, #tpu.memory_space<vmem>>, vector<32x32xbf16>
      %cst_44 = arith.constant dense<0.000000e+00> : vector<8x32xf32>
      %84 = tpu.matmul %77, %83, %cst_44 {dimension_numbers = #tpu.dot_dimension_numbers<[1], [0], [0], [1], [0, 0, 1, 1], [], []>} : vector<8x32xbf16>, vector<32x32xbf16>, vector<8x32xf32> -> vector<8x32xf32>
      %c0_45 = arith.constant 0 : index
      %c0_46 = arith.constant 0 : index
      %85 = vector.load %arg9[%c0_45, %c0_46] : memref<1x32xf32, #tpu.memory_space<vmem>>, vector<1x32xf32>
      %86 = vector.broadcast %85 : vector<1x32xf32> to vector<8x32xf32>
      %87 = arith.addf %84, %86 : vector<8x32xf32>
      %88 = arith.truncf %82 : vector<8x32xf32> to vector<8x32xbf16>
      %89 = arith.truncf %87 : vector<8x32xf32> to vector<8x32xbf16>
      %90 = vector.extract_strided_slice %88 {offsets = [0, 0], sizes = [8, 8], strides = [1, 1]} : vector<8x32xbf16> to vector<8x8xbf16>
      %c0_47 = arith.constant 0 : index
      %c0_48 = arith.constant 0 : index
      %c0_49 = arith.constant 0 : index
      %91 = vector.load %arg15[%c0_47, %c0_48, %c0_49] : memref<4x8x8xbf16, #tpu.memory_space<vmem>>, vector<1x8x8xbf16>
      %92 = vector.shape_cast %91 : vector<1x8x8xbf16> to vector<8x8xbf16>
      %93 = vector.shape_cast %90 : vector<8x8xbf16> to vector<1x8x8xbf16>
      tpu.vector_store %arg15[%c0_47, %c0_48, %c0_49], %93 {strides = array<i32>} : memref<4x8x8xbf16, #tpu.memory_space<vmem>>, vector<1x8x8xbf16>,
      %94 = vector.extract_strided_slice %89 {offsets = [0, 0], sizes = [8, 8], strides = [1, 1]} : vector<8x32xbf16> to vector<8x8xbf16>
      %c0_50 = arith.constant 0 : index
      %c0_51 = arith.constant 0 : index
      %c0_52 = arith.constant 0 : index
      %95 = vector.load %arg16[%c0_50, %c0_51, %c0_52] : memref<4x8x8xbf16, #tpu.memory_space<vmem>>, vector<1x8x8xbf16>
      %96 = vector.shape_cast %95 : vector<1x8x8xbf16> to vector<8x8xbf16>
      %97 = vector.shape_cast %94 : vector<8x8xbf16> to vector<1x8x8xbf16>
      tpu.vector_store %arg16[%c0_50, %c0_51, %c0_52], %97 {strides = array<i32>} : memref<4x8x8xbf16, #tpu.memory_space<vmem>>, vector<1x8x8xbf16>,
      %98 = vector.extract_strided_slice %88 {offsets = [0, 8], sizes = [8, 8], strides = [1, 1]} : vector<8x32xbf16> to vector<8x8xbf16>
      %c1 = arith.constant 1 : index
      %c0_53 = arith.constant 0 : index
      %c0_54 = arith.constant 0 : index
      %99 = vector.load %arg15[%c1, %c0_53, %c0_54] : memref<4x8x8xbf16, #tpu.memory_space<vmem>>, vector<1x8x8xbf16>
      %100 = vector.shape_cast %99 : vector<1x8x8xbf16> to vector<8x8xbf16>
      %101 = vector.shape_cast %98 : vector<8x8xbf16> to vector<1x8x8xbf16>
      tpu.vector_store %arg15[%c1, %c0_53, %c0_54], %101 {strides = array<i32>} : memref<4x8x8xbf16, #tpu.memory_space<vmem>>, vector<1x8x8xbf16>,
      %102 = vector.extract_strided_slice %89 {offsets = [0, 8], sizes = [8, 8], strides = [1, 1]} : vector<8x32xbf16> to vector<8x8xbf16>
      %c1_55 = arith.constant 1 : index
      %c0_56 = arith.constant 0 : index
      %c0_57 = arith.constant 0 : index
      %103 = vector.load %arg16[%c1_55, %c0_56, %c0_57] : memref<4x8x8xbf16, #tpu.memory_space<vmem>>, vector<1x8x8xbf16>
      %104 = vector.shape_cast %103 : vector<1x8x8xbf16> to vector<8x8xbf16>
      %105 = vector.shape_cast %102 : vector<8x8xbf16> to vector<1x8x8xbf16>
      tpu.vector_store %arg16[%c1_55, %c0_56, %c0_57], %105 {strides = array<i32>} : memref<4x8x8xbf16, #tpu.memory_space<vmem>>, vector<1x8x8xbf16>,
      %106 = vector.extract_strided_slice %88 {offsets = [0, 16], sizes = [8, 8], strides = [1, 1]} : vector<8x32xbf16> to vector<8x8xbf16>
      %c2 = arith.constant 2 : index
      %c0_58 = arith.constant 0 : index
      %c0_59 = arith.constant 0 : index
      %107 = vector.load %arg15[%c2, %c0_58, %c0_59] : memref<4x8x8xbf16, #tpu.memory_space<vmem>>, vector<1x8x8xbf16>
      %108 = vector.shape_cast %107 : vector<1x8x8xbf16> to vector<8x8xbf16>
      %109 = vector.shape_cast %106 : vector<8x8xbf16> to vector<1x8x8xbf16>
      tpu.vector_store %arg15[%c2, %c0_58, %c0_59], %109 {strides = array<i32>} : memref<4x8x8xbf16, #tpu.memory_space<vmem>>, vector<1x8x8xbf16>,
      %110 = vector.extract_strided_slice %89 {offsets = [0, 16], sizes = [8, 8], strides = [1, 1]} : vector<8x32xbf16> to vector<8x8xbf16>
      %c2_60 = arith.constant 2 : index
      %c0_61 = arith.constant 0 : index
      %c0_62 = arith.constant 0 : index
      %111 = vector.load %arg16[%c2_60, %c0_61, %c0_62] : memref<4x8x8xbf16, #tpu.memory_space<vmem>>, vector<1x8x8xbf16>
      %112 = vector.shape_cast %111 : vector<1x8x8xbf16> to vector<8x8xbf16>
      %113 = vector.shape_cast %110 : vector<8x8xbf16> to vector<1x8x8xbf16>
      tpu.vector_store %arg16[%c2_60, %c0_61, %c0_62], %113 {strides = array<i32>} : memref<4x8x8xbf16, #tpu.memory_space<vmem>>, vector<1x8x8xbf16>,
      %114 = vector.extract_strided_slice %88 {offsets = [0, 24], sizes = [8, 8], strides = [1, 1]} : vector<8x32xbf16> to vector<8x8xbf16>
      %c3 = arith.constant 3 : index
      %c0_63 = arith.constant 0 : index
      %c0_64 = arith.constant 0 : index
      %115 = vector.load %arg15[%c3, %c0_63, %c0_64] : memref<4x8x8xbf16, #tpu.memory_space<vmem>>, vector<1x8x8xbf16>
      %116 = vector.shape_cast %115 : vector<1x8x8xbf16> to vector<8x8xbf16>
      %117 = vector.shape_cast %114 : vector<8x8xbf16> to vector<1x8x8xbf16>
      tpu.vector_store %arg15[%c3, %c0_63, %c0_64], %117 {strides = array<i32>} : memref<4x8x8xbf16, #tpu.memory_space<vmem>>, vector<1x8x8xbf16>,
      %118 = vector.extract_strided_slice %89 {offsets = [0, 24], sizes = [8, 8], strides = [1, 1]} : vector<8x32xbf16> to vector<8x8xbf16>
      %c3_65 = arith.constant 3 : index
      %c0_66 = arith.constant 0 : index
      %c0_67 = arith.constant 0 : index
      %119 = vector.load %arg16[%c3_65, %c0_66, %c0_67] : memref<4x8x8xbf16, #tpu.memory_space<vmem>>, vector<1x8x8xbf16>
      %120 = vector.shape_cast %119 : vector<1x8x8xbf16> to vector<8x8xbf16>
      %121 = vector.shape_cast %118 : vector<8x8xbf16> to vector<1x8x8xbf16>
      tpu.vector_store %arg16[%c3_65, %c0_66, %c0_67], %121 {strides = array<i32>} : memref<4x8x8xbf16, #tpu.memory_space<vmem>>, vector<1x8x8xbf16>,
    } else {
    }
    %c0 = arith.constant 0 : index
    %c0_1 = arith.constant 0 : index
    %c0_2 = arith.constant 0 : index
    %3 = vector.load %arg2[%c0, %c0_1, %c0_2] : memref<1x8x32xf32, #tpu.memory_space<vmem>>, vector<1x8x32xf32>
    %4 = vector.shape_cast %3 : vector<1x8x32xf32> to vector<8x32xf32>
    %5 = arith.truncf %4 : vector<8x32xf32> to vector<8x32xbf16>
    %c0_3 = arith.constant 0 : index
    %c0_4 = arith.constant 0 : index
    %6 = vector.load %arg4[%c0_3, %c0_4] : memref<32x32xbf16, #tpu.memory_space<vmem>>, vector<32x32xbf16>
    %cst = arith.constant dense<0.000000e+00> : vector<8x32xf32>
    %7 = tpu.matmul %5, %6, %cst {dimension_numbers = #tpu.dot_dimension_numbers<[1], [0], [0], [1], [0, 0, 1, 1], [], []>} : vector<8x32xbf16>, vector<32x32xbf16>, vector<8x32xf32> -> vector<8x32xf32>
    %c0_5 = arith.constant 0 : index
    %c0_6 = arith.constant 0 : index
    %8 = vector.load %arg5[%c0_5, %c0_6] : memref<1x32xf32, #tpu.memory_space<vmem>>, vector<1x32xf32>
    %9 = vector.broadcast %8 : vector<1x32xf32> to vector<8x32xf32>
    %10 = arith.addf %7, %9 : vector<8x32xf32>
    %11 = arith.truncf %10 : vector<8x32xf32> to vector<8x32xbf16>
    %12 = vector.extract_strided_slice %11 {offsets = [0, 0], sizes = [8, 8], strides = [1, 1]} : vector<8x32xbf16> to vector<8x8xbf16>
    %13 = vector.extract_strided_slice %11 {offsets = [0, 8], sizes = [8, 8], strides = [1, 1]} : vector<8x32xbf16> to vector<8x8xbf16>
    %14 = vector.extract_strided_slice %11 {offsets = [0, 16], sizes = [8, 8], strides = [1, 1]} : vector<8x32xbf16> to vector<8x8xbf16>
    %15 = vector.extract_strided_slice %11 {offsets = [0, 24], sizes = [8, 8], strides = [1, 1]} : vector<8x32xbf16> to vector<8x8xbf16>
    %16 = vector.shape_cast %12 : vector<8x8xbf16> to vector<1x8x8xbf16>
    %17 = vector.shape_cast %13 : vector<8x8xbf16> to vector<1x8x8xbf16>
    %18 = vector.shape_cast %14 : vector<8x8xbf16> to vector<1x8x8xbf16>
    %19 = vector.shape_cast %15 : vector<8x8xbf16> to vector<1x8x8xbf16>
    %20 = tpu.concatenate %16, %17, %18, %19 in 0 : vector<1x8x8xbf16>, vector<1x8x8xbf16>, vector<1x8x8xbf16>, vector<1x8x8xbf16> -> vector<4x8x8xbf16>
    %c0_7 = arith.constant 0 : index
    %c0_8 = arith.constant 0 : index
    %c0_9 = arith.constant 0 : index
    %21 = vector.load %arg15[%c0_7, %c0_8, %c0_9] : memref<4x8x8xbf16, #tpu.memory_space<vmem>>, vector<4x8x8xbf16>
    %c0_10 = arith.constant 0 : index
    %c0_11 = arith.constant 0 : index
    %c0_12 = arith.constant 0 : index
    %22 = vector.load %arg16[%c0_10, %c0_11, %c0_12] : memref<4x8x8xbf16, #tpu.memory_space<vmem>>, vector<4x8x8xbf16>
    "tpu.trace_start"() <{level = 10 : i32, message = "hqd,hkd->hqk"}> : () -> ()
    %cst_13 = arith.constant dense<0.000000e+00> : vector<4x8x8xf32>
    %23 = tpu.matmul %20, %21, %cst_13 {dimension_numbers = #tpu.dot_dimension_numbers<[2], [2], [1], [1], [0, 0, 0, 1, 1, 1], [0], [0]>} : vector<4x8x8xbf16>, vector<4x8x8xbf16>, vector<4x8x8xf32> -> vector<4x8x8xf32>
    "tpu.trace_stop"() : () -> ()
    %cst_14 = arith.constant dense<0xFF800000> : vector<4x8xf32>
    %24 = vector.multi_reduction <maximumf>, %23, %cst_14 [2] : vector<4x8x8xf32> to vector<4x8xf32>
    %25 = vector.shape_cast %24 : vector<4x8xf32> to vector<4x8x1xf32>
    %26 = vector.broadcast %25 : vector<4x8x1xf32> to vector<4x8x8xf32>
    %27 = arith.subf %23, %26 : vector<4x8x8xf32>
    %28 = math.exp %27 : vector<4x8x8xf32>
    %cst_15 = arith.constant dense<0.000000e+00> : vector<4x8xf32>
    %29 = vector.multi_reduction <add>, %28, %cst_15 [2] : vector<4x8x8xf32> to vector<4x8xf32>
    %30 = vector.shape_cast %29 : vector<4x8xf32> to vector<4x8x1xf32>
    %31 = arith.truncf %28 : vector<4x8x8xf32> to vector<4x8x8xbf16>
    "tpu.trace_start"() <{level = 10 : i32, message = "hqk,hkd->hqd"}> : () -> ()
    %cst_16 = arith.constant dense<0.000000e+00> : vector<4x8x8xf32>
    %32 = tpu.matmul %31, %22, %cst_16 {dimension_numbers = #tpu.dot_dimension_numbers<[2], [1], [1], [2], [0, 0, 0, 1, 1, 2], [0], [0]>} : vector<4x8x8xbf16>, vector<4x8x8xbf16>, vector<4x8x8xf32> -> vector<4x8x8xf32>
    "tpu.trace_stop"() : () -> ()
    %33 = vector.broadcast %30 : vector<4x8x1xf32> to vector<4x8x8xf32>
    %34 = arith.divf %32, %33 : vector<4x8x8xf32>
    %35 = arith.truncf %34 : vector<4x8x8xf32> to vector<4x8x8xbf16>
    %36 = vector.extract_strided_slice %35 {offsets = [0, 0, 0], sizes = [1, 8, 8], strides = [1, 1, 1]} : vector<4x8x8xbf16> to vector<1x8x8xbf16>
    %37 = vector.shape_cast %36 : vector<1x8x8xbf16> to vector<8x8xbf16>
    %38 = vector.extract_strided_slice %35 {offsets = [1, 0, 0], sizes = [1, 8, 8], strides = [1, 1, 1]} : vector<4x8x8xbf16> to vector<1x8x8xbf16>
    %39 = vector.shape_cast %38 : vector<1x8x8xbf16> to vector<8x8xbf16>
    %40 = vector.extract_strided_slice %35 {offsets = [2, 0, 0], sizes = [1, 8, 8], strides = [1, 1, 1]} : vector<4x8x8xbf16> to vector<1x8x8xbf16>
    %41 = vector.shape_cast %40 : vector<1x8x8xbf16> to vector<8x8xbf16>
    %42 = vector.extract_strided_slice %35 {offsets = [3, 0, 0], sizes = [1, 8, 8], strides = [1, 1, 1]} : vector<4x8x8xbf16> to vector<1x8x8xbf16>
    %43 = vector.shape_cast %42 : vector<1x8x8xbf16> to vector<8x8xbf16>
    %44 = tpu.concatenate %37, %39, %41, %43 in 1 : vector<8x8xbf16>, vector<8x8xbf16>, vector<8x8xbf16>, vector<8x8xbf16> -> vector<8x32xbf16>
    %c0_17 = arith.constant 0 : index
    %c0_18 = arith.constant 0 : index
    %45 = vector.load %arg10[%c0_17, %c0_18] : memref<32x32xbf16, #tpu.memory_space<vmem>>, vector<32x32xbf16>
    %cst_19 = arith.constant dense<0.000000e+00> : vector<8x32xf32>
    %46 = tpu.matmul %44, %45, %cst_19 {dimension_numbers = #tpu.dot_dimension_numbers<[1], [0], [0], [1], [0, 0, 1, 1], [], []>} : vector<8x32xbf16>, vector<32x32xbf16>, vector<8x32xf32> -> vector<8x32xf32>
    %c0_20 = arith.constant 0 : index
    %c0_21 = arith.constant 0 : index
    %47 = vector.load %arg11[%c0_20, %c0_21] : memref<1x32xf32, #tpu.memory_space<vmem>>, vector<1x32xf32>
    %48 = vector.broadcast %47 : vector<1x32xf32> to vector<8x32xf32>
    %49 = arith.addf %46, %48 : vector<8x32xf32>
    %50 = arith.addf %4, %49 : vector<8x32xf32>
    %cst_22 = arith.constant dense<0.000000e+00> : vector<8xf32>
    %51 = vector.multi_reduction <add>, %50, %cst_22 [1] : vector<8x32xf32> to vector<8xf32>
    %52 = vector.shape_cast %51 : vector<8xf32> to vector<8x1xf32>
    %cst_23 = arith.constant 3.200000e+01 : f32
    %53 = vector.broadcast %cst_23 : f32 to vector<8x1xf32>
    %54 = arith.divf %52, %53 : vector<8x1xf32>
    %55 = vector.broadcast %54 : vector<8x1xf32> to vector<8x32xf32>
    %56 = arith.subf %50, %55 : vector<8x32xf32>
    %57 = arith.mulf %56, %56 : vector<8x32xf32>
    %cst_24 = arith.constant dense<0.000000e+00> : vector<8xf32>
    %58 = vector.multi_reduction <add>, %57, %cst_24 [1] : vector<8x32xf32> to vector<8xf32>
    %59 = vector.shape_cast %58 : vector<8xf32> to vector<8x1xf32>
    %cst_25 = arith.constant 3.200000e+01 : f32
    %60 = vector.broadcast %cst_25 : f32 to vector<8x1xf32>
    %61 = arith.divf %59, %60 : vector<8x1xf32>
    %cst_26 = arith.constant 9.99999974E-6 : f32
    %62 = vector.broadcast %cst_26 : f32 to vector<8x1xf32>
    %63 = arith.addf %61, %62 : vector<8x1xf32>
    %64 = math.rsqrt %63 : vector<8x1xf32>
    %65 = vector.broadcast %64 : vector<8x1xf32> to vector<8x32xf32>
    %66 = arith.mulf %56, %65 : vector<8x32xf32>
    %c0_27 = arith.constant 0 : index
    %c0_28 = arith.constant 0 : index
    %67 = vector.load %arg12[%c0_27, %c0_28] : memref<1x32xf32, #tpu.memory_space<vmem>>, vector<1x32xf32>
    %68 = vector.broadcast %67 : vector<1x32xf32> to vector<8x32xf32>
    %69 = arith.mulf %66, %68 : vector<8x32xf32>
    %c0_29 = arith.constant 0 : index
    %c0_30 = arith.constant 0 : index
    %70 = vector.load %arg13[%c0_29, %c0_30] : memref<1x32xf32, #tpu.memory_space<vmem>>, vector<1x32xf32>
    %71 = vector.broadcast %70 : vector<1x32xf32> to vector<8x32xf32>
    %72 = arith.addf %69, %71 : vector<8x32xf32>
    %c0_31 = arith.constant 0 : index
    %c0_32 = arith.constant 0 : index
    %c0_33 = arith.constant 0 : index
    %73 = vector.load %arg14[%c0_31, %c0_32, %c0_33] : memref<1x8x32xf32, #tpu.memory_space<vmem>>, vector<1x8x32xf32>
    %74 = vector.shape_cast %73 : vector<1x8x32xf32> to vector<8x32xf32>
    %75 = vector.shape_cast %72 : vector<8x32xf32> to vector<1x8x32xf32>
    tpu.vector_store %arg14[%c0_31, %c0_32, %c0_33], %75 {strides = array<i32>} : memref<1x8x32xf32, #tpu.memory_space<vmem>>, vector<1x8x32xf32>,
    return
  }
  func.func @transform_0(%arg0: i32, %arg1: i32) -> (i32, i32, i32) {
    %c0_i32 = arith.constant 0 : i32
    %c0_i32_0 = arith.constant 0 : i32
    return %arg0, %arg1, %c0_i32 : i32, i32, i32
  }
  func.func @transform_1(%arg0: i32, %arg1: i32) -> (i32, i32, i32) {
    %c0_i32 = arith.constant 0 : i32
    %c0_i32_0 = arith.constant 0 : i32
    %c0_i32_1 = arith.constant 0 : i32
    return %arg0, %c0_i32, %c0_i32_0 : i32, i32, i32
  }
  func.func @transform_2(%arg0: i32, %arg1: i32) -> (i32, i32) {
    %c0_i32 = arith.constant 0 : i32
    %c0_i32_0 = arith.constant 0 : i32
    %c0_i32_1 = arith.constant 0 : i32
    return %c0_i32, %c0_i32_0 : i32, i32
  }
  func.func @transform_3(%arg0: i32, %arg1: i32) -> (i32, i32) {
    %c0_i32 = arith.constant 0 : i32
    %c0_i32_0 = arith.constant 0 : i32
    %c0_i32_1 = arith.constant 0 : i32
    return %c0_i32, %c0_i32_0 : i32, i32
  }
  func.func @transform_4(%arg0: i32, %arg1: i32) -> (i32, i32) {
    %c0_i32 = arith.constant 0 : i32
    %c0_i32_0 = arith.constant 0 : i32
    %c0_i32_1 = arith.constant 0 : i32
    return %c0_i32, %c0_i32_0 : i32, i32
  }
  func.func @transform_5(%arg0: i32, %arg1: i32) -> (i32, i32) {
    %c0_i32 = arith.constant 0 : i32
    %c0_i32_0 = arith.constant 0 : i32
    %c0_i32_1 = arith.constant 0 : i32
    return %c0_i32, %c0_i32_0 : i32, i32
  }
  func.func @transform_6(%arg0: i32, %arg1: i32) -> (i32, i32) {
    %c0_i32 = arith.constant 0 : i32
    %c0_i32_0 = arith.constant 0 : i32
    %c0_i32_1 = arith.constant 0 : i32
    return %c0_i32, %c0_i32_0 : i32, i32
  }
  func.func @transform_7(%arg0: i32, %arg1: i32) -> (i32, i32) {
    %c0_i32 = arith.constant 0 : i32
    %c0_i32_0 = arith.constant 0 : i32
    %c0_i32_1 = arith.constant 0 : i32
    return %c0_i32, %c0_i32_0 : i32, i32
  }
  func.func @transform_8(%arg0: i32, %arg1: i32) -> (i32, i32) {
    %c0_i32 = arith.constant 0 : i32
    %c0_i32_0 = arith.constant 0 : i32
    %c0_i32_1 = arith.constant 0 : i32
    return %c0_i32, %c0_i32_0 : i32, i32
  }
  func.func @transform_9(%arg0: i32, %arg1: i32) -> (i32, i32) {
    %c0_i32 = arith.constant 0 : i32
    %c0_i32_0 = arith.constant 0 : i32
    %c0_i32_1 = arith.constant 0 : i32
    return %c0_i32, %c0_i32_0 : i32, i32
  }
  func.func @transform_10(%arg0: i32, %arg1: i32) -> (i32, i32) {
    %c0_i32 = arith.constant 0 : i32
    %c0_i32_0 = arith.constant 0 : i32
    %c0_i32_1 = arith.constant 0 : i32
    return %c0_i32, %c0_i32_0 : i32, i32
  }
  func.func @transform_11(%arg0: i32, %arg1: i32) -> (i32, i32) {
    %c0_i32 = arith.constant 0 : i32
    %c0_i32_0 = arith.constant 0 : i32
    %c0_i32_1 = arith.constant 0 : i32
    return %c0_i32, %c0_i32_0 : i32, i32
  }
  func.func @transform_12(%arg0: i32, %arg1: i32) -> (i32, i32, i32) {
    %c0_i32 = arith.constant 0 : i32
    %c0_i32_0 = arith.constant 0 : i32
    return %arg0, %arg1, %c0_i32 : i32, i32, i32
  }
}

</mosaic_0001>

<bundles_post_ra>
// kernel: tpu_custom_call.1
= control target key start
LH: loop header
LB: loop body
LE: loop exit
PB: predicated region body
PF: predicated region fallthrough
CT: control target
= control target key end

     0   :  { %s2535_s0 = inlined_call_operand.hbm [shape: f32[2,8,32], index: 0, kind: input, shape index: {}]   ;;  %s2536_s1 = inlined_call_operand.hbm [shape: bf16[2,8,32], index: 1, kind: input, shape index: {}]   ;;  %s2537_s2 = inlined_call_operand.hbm [shape: bf16[32,32], index: 2, kind: input, shape index: {}]   ;;  %s2538_s3 = inlined_call_operand.vmem [shape: f32[1,32], index: 3, kind: input, shape index: {}]   ;;  %s2539_s4 = inlined_call_operand.hbm [shape: bf16[32,32], index: 4, kind: input, shape index: {}]   ;;  %s2540_s5 = inlined_call_operand.vmem [shape: f32[1,32], index: 5, kind: input, shape index: {}]   ;;  %s2541_s6 = inlined_call_operand.vmem [shape: bf16[32,32], index: 6, kind: input, shape index: {}]   ;;  %s2542_s7 = inlined_call_operand.vmem [shape: f32[1,32], index: 7, kind: input, shape index: {}]   ;;  %s2543_s8 = inlined_call_operand.hbm [shape: bf16[32,32], index: 8, kind: input, shape index: {}]   ;;  %s2544_s9 = inlined_call_operand.vmem [shape: f32[1,32], index: 9, kind: input, shape index: {}]   ;;  %s2545_s10 = inlined_call_operand.vmem [shape: f32[1,32], index: 10, kind: input, shape index: {}]   ;;  %s2546_s11 = inlined_call_operand.vmem [shape: f32[1,32], index: 11, kind: input, shape index: {}]   ;;  %s2547_s12 = inlined_call_operand.hbm [shape: f32[2,8,32], index: 12, kind: output, shape index: {}]  }
   0x1   :  { %2555 = sst [smem:[#allocation22_spill]] %s2535_s0 }
   0x2   :  { %2556 = sst [smem:[#allocation23_spill]] %s2537_s2 }
   0x3   :  { %2557 = sst [smem:[#allocation24_spill]] %s2542_s7 }
   0x4   :  { %2558 = sst [smem:[#allocation25_spill]] %s2544_s9 }
   0x5   :  { %2559 = sst [smem:[#allocation26_spill]] %s2545_s10 }
   0x6   :  { %2560 = sst [smem:[#allocation27_spill]] %s2546_s11 }
   0x7   :  { %2561 = sst [smem:[#allocation28_spill]] %s2547_s12 }
   0x8   :  { %17 = vsyncpa [#allocation5], 0 }
   0x9   :  { %19 = vsyncpa [#allocation5 + $0x1], 0 }
   0xa   :  { %20 = vsyncpa [#allocation8], 0 }
   0xb   :  { %22 = vsyncpa [#allocation8 + $0x1], 0 }
   0xc   :  { %23 = vsyncpa [#allocation11], 0 }
   0xd   :  { %24 = vsyncpa [#allocation6], 0 }
   0xe   :  { %26 = vsyncpa [#allocation6 + $0x1], 0  ;;  %s2086_s21 = smov 0   ;;  %s2088_s22 = smov 0  }
   0xf   :  { %s2090_s23 = smov 0   ;;  %s2092_s24 = smov 0  }
  0x10   :  { %s2094_s25 = smov 0   ;;  %s2096_s26 = smov 0  }
  0x11 LB: > { %2562 = sst [smem:[#allocation19_spill]] %s1983_s21  ;;  %s2117_s27 = sadd.s32 4294967295, %s2003_s26   ;;  %s2003_s26 = sphi %s2096_s26, %s32_s26   ;;  %s1999_s25 = sphi %s2094_s25, %s2597_s25   ;;  %s1995_s24 = sphi %s2092_s24, %s2596_s24   ;;  %s1991_s23 = sphi %s2090_s23, %s2595_s23   ;;  %s1987_s22 = sphi %s2088_s22, %s2594_s22   ;;  %s1983_s21 = sphi %s2086_s21, %s2593_s21  }
  0x12   : > { %2563 = sst [smem:[#allocation20_spill]] %s1995_s24  ;;  %s1472_s28 = sadd.s32 4294967294, %s2003_s26  }
  0x13   : > { %p66_p0 = scmp.ne.s32.totalorder %s1987_s22, %s1983_s21  ;;  %p2551_p1 = scmp.eq.s32.totalorder %s2117_s27, 0 }
  0x14   : > { %p334_p3 = scmp.eq.s32.totalorder %s1472_s28, 1  ;;  %p1473_p5 = scmp.ge.s32.totalorder %s2003_s26, 1 }
  0x15   : > { %p2126_p4 = por %p2551_p1, %p66_p0  ;;  %p341_p7 = scmp.lt.s32.totalorder %s2003_s26, 3 }
  0x16   : > { %p2131_p6 = por %p334_p3, %p66_p0  ;;  %s2005_s14 = smov [#allocation9]  }
  0x17   : > { %s2564_s29 = scalar_select %p2126_p4, 1, 0 }
  0x18   : > { %s2565_s30 = scalar_select %p2131_p6, 1, 0 }
  0x19   : > { %p2136_p8 = pnand %p1473_p5, %p341_p7  ;;  %s353_s15 = sshll.u32 %s2005_s14, 4  ;;  %s2140_s15 = int_to_ptr.vmem [resolvable:$true] %s353_s15 }
  0x1a   : > { %2566 = sst [smem:[#allocation21_spill]] %s2565_s30  ;;  %s2006_s17 = smov [#allocation10]  }
  0x1b   : > { %s2567_s13 = scalar_select %p2136_p8, 1, 0 }
  0x1c   : > { %p1649_p9 = pneg %p2136_p8  ;;  %s369_s18 = sshll.u32 %s2006_s17, 4  ;;  %s2151_s18 = int_to_ptr.vmem [resolvable:$true] %s369_s18 }
  0x1d   : > { %s2007_s19 = smov [#allocation12]   ;;  %s2569_s2 = sld [smem:[#allocation23_spill]] }
  0x1e   : > { %p2147_p11 = pnand %p1649_p9, %p2551_p1  ;;  %s2153_s20 = sshll.u32 %s2007_s19, 4  ;;  %s392_s20 = int_to_ptr.vmem [resolvable:$true] %s2153_s20 }
  0x20   : > { %p2163_p13 = pneg %p2147_p11 }
  0x23   : > { %s1765_s30 = scalar_lea.hbm %s2569_s2, 256 }
  0x24   : > { %p1766_p12 = scmp.ne.s32.totalorder %s2569_s2, %s1765_s30  ;;  %p1772_p5 = scmp.lt.u32.totalorder %s1765_s30, %s2569_s2 }
  0x26   : > { %p1768_p0 = pnand %p2163_p13, %p1766_p12 }
  0x28   : > { %p1769_p3 = pneg %p1768_p0 }
  0x2a   : > { %p1774_p7 = pnand %p1772_p5, %p1769_p3 }
  0x2c   : > { %1777 = shalt.err (!%p1774_p7)
}
  0x2d   : > { %s1778_s12 = scalar_lea.vmem %s2140_s15, 256  ;;  %p1786_p2 = scmp.lt.s32.totalorder %s2140_s15, %s2140_s15 }
  0x2e   : > { %p1779_p9 = scmp.ne.s32.totalorder %s2140_s15, %s1778_s12  ;;  %p1787_p6 = scmp.lt.s32.totalorder %s1778_s12, %s1778_s12 }
  0x30   : > { %p1781_p10 = pnand %p1779_p9, %p2163_p13  ;;  %p1788_p12 = por %p1787_p6, %p1786_p2 }
  0x32   : > { %p1782_p1 = pneg %p1781_p10 }
  0x34   : > { %p1789_p0 = pnand %p1788_p12, %p1782_p1 }
  0x36   : > { %1792 = shalt.err (!%p1789_p0)
}
  0x37   : > { %s2008_s21 = smov 64   ;;  %s2009_s30 = smov 4  }
  0x38   : > { %1652 = dma.hbm_to_vmem [thread:$0]  (!%p2147_p11), %s2569_s2, 256, %s2140_s15, [#allocation8], %s2008_s21, %s2008_s21, %s2009_s30  }
  0x39   : > { %s1793_s12 = scalar_lea.hbm %s2539_s4, 256 }
  0x3a   : > { %p1794_p1 = scmp.ne.s32.totalorder %s2539_s4, %s1793_s12  ;;  %p1800_p10 = scmp.lt.u32.totalorder %s1793_s12, %s2539_s4 }
  0x3c   : > { %p1796_p2 = pnand %p1794_p1, %p2163_p13 }
  0x3e   : > { %p1797_p6 = pneg %p1796_p2 }
  0x40   : > { %p1802_p3 = pnand %p1800_p10, %p1797_p6 }
  0x42   : > { %1805 = shalt.err (!%p1802_p3)
}
  0x43   : > { %s1806_s15 = scalar_lea.vmem %s2151_s18, 256  ;;  %p1814_p12 = scmp.lt.s32.totalorder %s2151_s18, %s2151_s18 }
  0x44   : > { %p1807_p5 = scmp.ne.s32.totalorder %s2151_s18, %s1806_s15  ;;  %p1815_p0 = scmp.lt.s32.totalorder %s1806_s15, %s1806_s15 }
  0x46   : > { %p1809_p7 = pnand %p1807_p5, %p2163_p13  ;;  %p1816_p1 = por %p1815_p0, %p1814_p12 }
  0x48   : > { %p1810_p9 = pneg %p1809_p7 }
  0x4a   : > { %p1817_p2 = pnand %p1816_p1, %p1810_p9 }
  0x4c   : > { %1820 = shalt.err (!%p1817_p2)
}
  0x4d   : > { %1655 = dma.hbm_to_vmem [thread:$0]  (!%p2147_p11), %s2539_s4, 256, %s2151_s18, [#allocation11], %s2008_s21, %s2008_s21, %s2009_s30  }
  0x4e   : > { %s1821_s28 = scalar_lea.hbm %s2543_s8, 256 }
  0x4f   : > { %p1822_p6 = scmp.ne.s32.totalorder %s2543_s8, %s1821_s28  ;;  %p1828_p5 = scmp.lt.u32.totalorder %s1821_s28, %s2543_s8 }
  0x51   : > { %p1824_p10 = pnand %p1822_p6, %p2163_p13 }
  0x53   : > { %p1825_p3 = pneg %p1824_p10 }
  0x55   : > { %p1830_p7 = pnand %p1828_p5, %p1825_p3 }
  0x57   : > { %1833 = shalt.err (!%p1830_p7)
}
  0x58   : > { %s1834_s15 = scalar_lea.vmem %s392_s20, 256  ;;  %p1842_p1 = scmp.lt.s32.totalorder %s392_s20, %s392_s20 }
  0x59   : > { %p1835_p9 = scmp.ne.s32.totalorder %s392_s20, %s1834_s15  ;;  %p1843_p2 = scmp.lt.s32.totalorder %s1834_s15, %s1834_s15 }
  0x5b   : > { %p1837_p12 = pnand %p1835_p9, %p2163_p13  ;;  %p1844_p4 = por %p1843_p2, %p1842_p1 }
  0x5d   : > { %p1838_p0 = pneg %p1837_p12 }
  0x5f   : > { %p1845_p8 = pnand %p1844_p4, %p1838_p0 }
  0x61   : > { %1848 = shalt.err (!%p1845_p8)
}
  0x62   : > { %1658 = dma.hbm_to_vmem [thread:$0]  (!%p2147_p11), %s2543_s8, 256, %s392_s20, [#allocation11], %s2008_s21, %s2008_s21, %s2009_s30  }
  0x63   : > { %s53_s11 = sadd.s32 1, %s1991_s23  ;;  %s44_s16 = sadd.s32 1, %s1999_s25 }
  0x64   : > { %p60_p4 = scmp.ne.s32.totalorder %s1991_s23, %s1987_s22  ;;  %p46_p8 = scmp.ge.s32.totalorder %s44_s16, 2 }
  0x65   : > { %p61_p13 = scmp.eq.s32.totalorder %s2003_s26, 0  ;;  %p2571_p6 = scmp.eq.s32.totalorder %s2117_s27, 1 }
  0x66   : > { %p1673_p3 = scmp.lt.s32.totalorder %s2003_s26, 2  ;;  %s2599_s16 = smov (%p46_p8, %s44_s16), 0 }
  0x67   : > { %p2242_p10 = por %p2571_p6, %p60_p4  ;;  %p62_p5 = por %p61_p13, %p60_p4 }
  0x68   : > { %s2250_s10 = sand.u32 1, %s1991_s23   ;;  %s48_s20 = ssub.s32 %s1999_s25, %s2599_s16 }
  0x69   : > { %s2572_s9 = scalar_select %p2242_p10, 1, 0 }
  0x6a   : > { %p51_p11 = scmp.eq.s32.totalorder %s48_s20, 0  ;;  %s1478_s21 = sshll.u32 %s2250_s10, 3 }
  0x6b   : > { %s1479_s30 = sshll.u32 %s1999_s25, 7  ;;  %s2573_s0 = sld [smem:[#allocation22_spill]] }
  0x6c   : > { %s2257_s24 = scalar_select %p51_p11, %s1991_s23, %s53_s11  }
  0x6d   : > { %s418_s19 = scalar_lea.vmem [#allocation4], %s1478_s21  ;;  %p2268_p7 = pnand %p1673_p3, %p62_p5 }
  0x6e   : > { %s426_s12 = sshll.u32 %s418_s19, 4  ;;  %s1480_s7 = sshll.u32 %s2250_s10, 2  ;;  %s2264_s12 = int_to_ptr.vmem [resolvable:$true] %s426_s12 }
  0x6f   : > { %s415_s11 = scalar_lea.sflag [#allocation5], %s2250_s10  ;;  %p1851_p12 = pneg %p2268_p7 }
  0x71   : > { %s2262_s17 = scalar_lea.hbm %s2573_s0, %s1479_s30  ;;  %s1854_s28 = scalar_lea.hbm %s2573_s0, 256 }
  0x72   : > { %s1849_s20 = scalar_lea.hbm %s2262_s17, 128  ;;  %p1855_p2 = scmp.lt.u32.totalorder %s2262_s17, %s2573_s0 }
  0x73   : > { %p1850_p9 = scmp.ne.s32.totalorder %s2262_s17, %s1849_s20  ;;  %p1856_p4 = scmp.lt.u32.totalorder %s1854_s28, %s1849_s20 }
  0x74   : > { %p1858_p13 = scmp.lt.u32.totalorder %s1849_s20, %s2262_s17 }
  0x75   : > { %p1852_p0 = pnand %p1851_p12, %p1850_p9  ;;  %p1857_p8 = por %p1856_p4, %p1855_p2 }
  0x77   : > { %p1853_p1 = pneg %p1852_p0  ;;  %p1859_p6 = por %p1858_p13, %p1857_p8 }
  0x79   : > { %p1860_p3 = pnand %p1859_p6, %p1853_p1 }
  0x7b   : > { %1863 = shalt.err (!%p1860_p3)
}
  0x7c   : > { %s1864_s18 = scalar_lea.vmem %s2264_s12, 128  ;;  %s2010_s21 = smov [#allocation4]  }
  0x7d   : > { %p1865_p5 = scmp.ne.s32.totalorder %s2264_s12, %s1864_s18  ;;  %s1869_s30 = sshll.u32 %s2010_s21, 4  ;;  %s1870_s30 = int_to_ptr.vmem [resolvable:$false] %s1869_s30 }
  0x7e   : > { %s1871_s14 = scalar_lea.vmem %s1870_s30, 256  ;;  %p1872_p0 = scmp.lt.s32.totalorder %s2264_s12, %s1870_s30 }
  0x7f   : > { %p1867_p11 = pnand %p1865_p5, %p1851_p12  ;;  %p1873_p2 = scmp.lt.s32.totalorder %s1871_s14, %s1864_s18 }
  0x81   : > { %p1868_p9 = pneg %p1867_p11  ;;  %p1874_p4 = por %p1873_p2, %p1872_p0 }
  0x83   : > { %p1875_p8 = pnand %p1874_p4, %p1868_p9 }
  0x85   : > { %1878 = shalt.err (!%p1875_p8)
}
  0x86   : > { %1662 = dma.hbm_to_vmem [thread:$0]  (!%p2268_p7), %s2262_s17, 128, %s2264_s12, %s415_s11  }
  0x87   : > { %s1481_s20 = sshll.u32 %s1999_s25, 6  ;;  %s437_s18 = scalar_lea.vmem [#allocation7], %s1480_s7 }
  0x88   : > { %s2304_s21 = scalar_lea.hbm %s2536_s1, %s1481_s20  ;;  %s444_s30 = sshll.u32 %s437_s18, 4  ;;  %s445_s30 = int_to_ptr.vmem [resolvable:$true] %s444_s30 }
  0x89   : > { %s2575_s14 = sand.u32 1, %s2003_s26   ;;  %s1879_s2 = scalar_lea.hbm %s2304_s21, 64 }
  0x8a   : > { %s434_s0 = scalar_lea.sflag [#allocation8], %s2575_s14  ;;  %p1880_p1 = scmp.ne.s32.totalorder %s2304_s21, %s1879_s2 }
  0x8b   : > { %s1884_s11 = scalar_lea.hbm %s2536_s1, 128  ;;  %p1885_p3 = scmp.lt.u32.totalorder %s2304_s21, %s2536_s1 }
  0x8c   : > { %p1882_p13 = pnand %p1880_p1, %p1851_p12  ;;  %p1886_p5 = scmp.lt.u32.totalorder %s1884_s11, %s1879_s2 }
  0x8d   : > { %p1888_p9 = scmp.lt.u32.totalorder %s1879_s2, %s2304_s21 }
  0x8e   : > { %p1883_p6 = pneg %p1882_p13  ;;  %p1887_p11 = por %p1886_p5, %p1885_p3 }
  0x90   : > { %p1889_p0 = por %p1888_p9, %p1887_p11 }
  0x92   : > { %p1890_p2 = pnand %p1889_p0, %p1883_p6 }
  0x94   : > { %1893 = shalt.err (!%p1890_p2)
}
  0x95   : > { %s1894_s7 = scalar_lea.vmem %s445_s30, 64  ;;  %s2011_s28 = smov [#allocation7]  }
  0x96   : > { %p1895_p4 = scmp.ne.s32.totalorder %s445_s30, %s1894_s7  ;;  %s1899_s19 = sshll.u32 %s2011_s28, 4  ;;  %s1900_s19 = int_to_ptr.vmem [resolvable:$false] %s1899_s19 }
  0x97   : > { %s1901_s18 = scalar_lea.vmem %s1900_s19, 128  ;;  %p1902_p13 = scmp.lt.s32.totalorder %s445_s30, %s1900_s19 }
  0x98   : > { %p1897_p8 = pnand %p1895_p4, %p1851_p12  ;;  %p1903_p10 = scmp.lt.s32.totalorder %s1901_s18, %s1894_s7 }
  0x9a   : > { %p1898_p1 = pneg %p1897_p8  ;;  %p1904_p3 = por %p1903_p10, %p1902_p13 }
  0x9c   : > { %p1905_p5 = pnand %p1904_p3, %p1898_p1 }
  0x9e   : > { %1908 = shalt.err (!%p1905_p5)
}
  0x9f   : > { %1665 = dma.hbm_to_vmem [thread:$0]  (!%p2268_p7), %s2304_s21, 64, %s445_s30, %s434_s0  }
  0xa0   : > { %p2576_p6 = scmp.ne.s32.totalorder %s2567_s13, 0 }
  0xa1   : > { %s2332_s2 = sand.u32 (!%p2576_p6), 1, %s1987_s22   ;;  %p2577_p10 = scmp.ne.s32.totalorder (!%p2576_p6), %s2564_s29, 0 }
  0xa2   : > { %453 = sbr.rel (%p2576_p6) target bundleno = 1794 (0x702), region = 68  ;;  %s1483_s14 = sshll.u32 (!%p2576_p6), %s2332_s2, 3 }
  0xa3   : > { %s456_s17 = scalar_lea.sflag (!%p2576_p6), [#allocation5], %s2332_s2  ;;  %s2338_s12 = scalar_lea.vmem (!%p2576_p6), [#allocation4], %s1483_s14 }
  0xa9   : > { %1962 = dma.done.wait (%p2577_p10), %s456_s17, 128  }
  0xaa   : > { %1964 = vsyncadd (%p2577_p10), %s456_s17, 4294967168  ;;  %s464_s0 = sand.u32 1, %s2117_s27   ;;  %s1484_s13 = sshll.u32 %s2332_s2, 2 }
  0xab   : > { %s465_s15 = scalar_lea.sflag [#allocation8], %s464_s0  ;;  %s468_s21 = scalar_lea.vmem [#allocation7], %s1484_s13 }
  0xac   : > { %1966 = dma.done.wait (%p2577_p10), %s465_s15, 64  }
  0xad   : > { %1968 = vsyncadd (%p2577_p10), %s465_s15, 4294967232  ;;  %p2578_p7 = scmp.eq.s32.totalorder %s2117_s27, 0 }
  0xaf   : > { %1970 = dma.done.wait (%p2578_p7), [#allocation8], 256   ;;  %p2579_p12 = pmov %p2578_p7 }
  0xb0   : > { %p2580_p11 = pmov %p2578_p7 }
  0xb1   : > { %1972 = vsyncadd (%p2579_p12), [#allocation8], 4294967040 }
  0xb2   : > { %1974 = dma.done.wait (%p2580_p11), [#allocation11], 512   ;;  %p2581_p9 = pmov %p2578_p7 }
  0xb3   : > { %v2012_v0 = vmov 0.0   ;;  %vm2013_vm0 = vmmov 0   ;;  %v1739_v1 = vld [vmem:[#allocation10] sm:$0xff]   ;;  %v1740_v2 = vld [vmem:[#allocation10 + $0x8] sm:$0xff]   ;;  %vm555_vm1 = vcmask 261120   ;;  %v1741_v4 = vld [vmem:[#allocation9] sm:$0xff]  }
  0xb4   : > { %1976 = vsyncadd (%p2581_p9), [#allocation11], 4294966784  ;;  %1551 = vmatprep.subr.bf16.mxu0 %v2012_v0  ;;  %1555 = vmatprep.mubr.msk.bf16.mxu0 %vm2013_vm0, %v2012_v0  ;;  %v531_v3 = vld [vmem:[%s468_s21] sm:$0xf]  ;;  %v1742_v5 = vld [vmem:[#allocation9 + $0x8] sm:$0xff]   ;;  %vm664_vm2 = vcmask 60416  }
  0xb5   : > { %1559 = vmatprep.subr.bf16.mxu1 %v2012_v0  ;;  %1563 = vmatprep.mubr.msk.bf16.mxu1 %vm2013_vm0, %v2012_v0  ;;  %v2370_v6 = vld [vmem:[%s2338_s12] sm:$0xff]  ;;  %s2014_s7 = smov 104   ;;  %s2015_s28 = smov 120   ;;  %vm788_vm3 = vcmask 64512   ;;  %vm1016_vm4 = vcmask 1043456   ;;  %vm1222_vm5 = vcmask 130048  }
  0xb6   : > { %1552 = vmatpush3.bf16.msra.mxu0 %v1739_v1  ;;  %v704_v7 = vpack.c.bf16 %v2370_v6, %v2370_v6  ;;  %v1743_v8 = vld [vmem:[%s2541_s6] sm:$0xff]   ;;  %v1744_v9 = vld [vmem:[%s2541_s6 + $0x8] sm:$0xff]   ;;  %s2016_s17 = smov 112   ;;  %s2582_s13 = sld [smem:[#allocation24_spill]]  ;;  %vm1225_vm6 = vcmask 195584  }
  0xb7   : > { %1553 = vmatprep.subr.bf16.mxu0 %v2012_v0  ;;  %1560 = vmatpush3.bf16.msra.mxu1 %v1743_v8  ;;  %v1489_v10 = vld [vmem:[%s2540_s5] ss:$0 sm:$0xff]  ;;  %s2017_s15 = smov 8   ;;  %s2018_s21 = smov 16  }
  0xb8   : > { %1561 = vmatprep.subr.bf16.mxu1 %v2012_v0  ;;  %v1499_v17 = vld [vmem:[%s2538_s3] ss:$0 sm:$0xff]  ;;  %s2019_s27 = smov 24   ;;  %s2583_s11 = sld [smem:[#allocation25_spill]] }
  0xb9   : > { %s2584_s10 = sld [smem:[#allocation20_spill]]  ;;  %s525_s0 = scalar_lea.vmem [#allocation13], %s1483_s14 }
  0xba   : > { %1554 = vmatpush3.bf16.msra.mxu0 %v1740_v2  ;;  %s1326_s30 = scalar_lea.sflag [#allocation6], %s2332_s2  ;;  %p2588_p2 = scmp.ne.s32.totalorder %s2572_s9, 0 }
  0xbb   : > { %1567 = vmatprep.subr.bf16.mxu0 %v2012_v0  ;;  %1562 = vmatpush3.bf16.msra.mxu1 %v1744_v9  ;;  %s2020_s14 = smov [#allocation13]  }
  0xbc   : > { %1575 = vmatprep.subr.bf16.mxu1 %v2012_v0  ;;  %v1493_v26 = vld [vmem:[%s2582_s13] ss:$0 sm:$0xff]  ;;  %s1340_s13 = sshll.u32 %s525_s0, 4  ;;  %s2487_s13 = int_to_ptr.vmem [resolvable:$true] %s1340_s13 }
  0xbd   : > { %1556 = vmatmul.mubr.msk.bf16.vlgmr.msra.gmra.mrb[0].mxu0 %vm555_vm1, %v531_v3 }
  0xbe   : > { %1568 = vmatpush3.bf16.msra.mxu0 %v1741_v4  ;;  %1571 = vmatprep.mubr.msk.bf16.mxu0 %vm2013_vm0, %v2012_v0 }
  0xbf   : > { %1569 = vmatprep.subr.bf16.mxu0 %v2012_v0  ;;  %1564 = vmatmul.mubr.msk.bf16.vlgmr.msra.gmra.mrb[0].mxu1 %vm555_vm1, %v531_v3  ;;  %s1518_s12 = sshll.u32 %s2584_s10, 7  ;;  %s1913_s10 = sshll.u32 %s2020_s14, 4  ;;  %s1914_s10 = int_to_ptr.vmem [resolvable:$false] %s1913_s10 }
  0xc0   : > { %1577 = vmatprep.mubr.msk.bf16.mxu1 %vm2013_vm0, %v2012_v0  ;;  %s1915_s20 = scalar_lea.vmem %s1914_s10, 256  ;;  %p1916_p1 = scmp.lt.s32.totalorder %s2487_s13, %s1914_s10 }
  0xc2   : > { %1570 = vmatpush3.bf16.msra.mxu0 %v1742_v5 }
  0xc3   : > { %1581 = vmatprep.subr.bf16.mxu0 %v2012_v0 }
  0xc5   : > { %1572 = vmatmul.mubr.msk.bf16.vlgmr.msra.gmra.mrb[4].mxu0 %vm555_vm1, %v704_v7 }
  0xc6   : > { %1583 = vmatprep.mubr.msk.bf16.mxu0 %vm2013_vm0, %v2012_v0 }
 0x190   : > { %v593_v11 = vpop.f32.mrb[0].mxu0 }
 0x191   : > { %v594_v12 = vadd.f32 %v1489_v10, %v593_v11  ;;  %v1557_v13 = vpop.f32.mrb[1].mxu0 }
 0x192   : > { %v596_v14 = vpop.f32.mrb[2].mxu0  ;;  %v656_v27 = vpop.f32.mrb[0].mxu1 }
 0x193   : > { %v662_v15 = vpack.c.bf16 %v594_v12, %v594_v12  ;;  %v1558_v16 = vpop.f32.mrb[3].mxu0  ;;  %v657_v28 = vadd.f32 %v1493_v26, %v656_v27  ;;  %v1565_v29 = vpop.f32.mrb[1].mxu1 }
 0x194   : > { %v659_v30 = vpop.f32.mrb[2].mxu1 }
 0x195   : > { %665 = vst.msk [vmem:[#allocation2] sm:$0xf] %vm664_vm2, %v662_v15  ;;  %693 = vrot.lane.b32.xlu1 %v662_v15, %s2014_s7  ;;  %670 = vrot.lane.b32.xlu0 %v662_v15, %s2015_s28  ;;  %v2409_v31 = vpack.c.bf16 %v657_v28, %v657_v28  ;;  %v1566_v32 = vpop.f32.mrb[3].mxu1 }
 0x197   : > { %666 = vst.msk [vmem:[#allocation3] sm:$0xf] %vm664_vm2, %v2409_v31 }
 0x198   : > { %v766_v18 = vpop.f32.mrb[4].mxu0 }
 0x199   : > { %683 = vrot.lane.b32.xlu0 %v662_v15, %s2016_s17  ;;  %v767_v19 = vadd.f32 %v1499_v17, %v766_v18  ;;  %v1573_v20 = vpop.f32.mrb[5].mxu0 }
 0x19a   : > { %v769_v21 = vpop.f32.mrb[6].mxu0 }
 0x19b   : > { %v772_v22 = vpack.c.bf16 %v767_v19, %v767_v19  ;;  %v1574_v23 = vpop.f32.mrb[7].mxu0 }
 0x19c   : > { %v780_v24 = vld [vmem:[#allocation2] sm:$0xf] }
 0x19d   : > { %v793_v25 = vsel %vm788_vm3, %v780_v24, 0  ;;  %774 = vrot.lane.b32.xlu1 %v772_v22, %s2015_s28  ;;  %776 = vrot.lane.b32.xlu0 %v772_v22, %s2016_s17 }
 0x19e   : > { %1576 = vmatpush3.bf16.xpose.msra.mxu1 %v793_v25  ;;  %v784_v42 = vld [vmem:[#allocation3] sm:$0xf] }
 0x19f   : > { %1587 = vmatprep.subr.bf16.mxu1 %v2012_v0  ;;  %v1018_v44 = vsel %vm1016_vm4, %v784_v42, 0 }
 0x1a1   : > { %778 = vrot.lane.b32.xlu1 %v772_v22, %s2014_s7 }
 0x1a5   : > { %1578 = vmatmul.mubr.msk.bf16.vlgmr.msra.gmra.mrb[4].mxu1 %vm788_vm3, %v772_v22  ;;  %678 = vrot.lane.b32.xlu1 %v2409_v31, %s2015_s28  ;;  %s2585_s28 = sld [smem:[#allocation26_spill]] }
 0x1a6   : > { %1589 = vmatprep.mubr.msk.bf16.mxu1 %vm2013_vm0, %v2012_v0 }
 0x207   : > { %v694_v33 = vpop.permute.xlu1 %693  ;;  %v671_v34 = vpop.permute.xlu0 %670 }
 0x208   : > { %697 = vst.msk [vmem:[#allocation2 + $0xc] sm:$0xf] %vm664_vm2, %v694_v33  ;;  %674 = vst.msk [vmem:[#allocation2 + $0x4] sm:$0xf] %vm664_vm2, %v671_v34 }
 0x20b   : > { %v684_v35 = vpop.permute.xlu0 %683 }
 0x20c   : > { %687 = vst.msk [vmem:[#allocation2 + $0x8] sm:$0xf] %vm664_vm2, %v684_v35 }
 0x20f   : > { %v781_v36 = vld [vmem:[#allocation2 + $0x4] sm:$0xf]  ;;  %v783_v40 = vld [vmem:[#allocation2 + $0xc] sm:$0xf]  ;;  %v775_v41 = vpop.permute.xlu1 %774  ;;  %v777_v45 = vpop.permute.xlu0 %776 }
 0x210   : > { %v839_v37 = vsel %vm788_vm3, %v781_v36, 0  ;;  %v931_v43 = vsel %vm788_vm3, %v783_v40, 0 }
 0x211   : > { %1582 = vmatpush3.bf16.xpose.msra.mxu0 %v839_v37 }
 0x212   : > { %1593 = vmatprep.subr.bf16.mxu0 %v2012_v0 }
 0x213   : > { %v782_v38 = vld [vmem:[#allocation2 + $0x8] sm:$0xf]  ;;  %v779_v46 = vpop.permute.xlu1 %778 }
 0x214   : > { %v885_v39 = vsel %vm788_vm3, %v782_v38, 0 }
 0x215   : > { %1588 = vmatpush3.bf16.xpose.msra.mxu1 %v885_v39 }
 0x216   : > { %1599 = vmatprep.subr.bf16.mxu1 %v2012_v0 }
 0x217   : > { %v679_v52 = vpop.permute.xlu1 %678 }
 0x218   : > { %1584 = vmatmul.mubr.msk.bf16.vlgmr.msra.gmra.mrb[8].mxu0 %vm788_vm3, %v775_v41  ;;  %682 = vst.msk [vmem:[#allocation3 + $0x4] sm:$0xf] %vm664_vm2, %v679_v52 }
 0x219   : > { %1594 = vmatpush3.bf16.xpose.msra.mxu0 %v931_v43  ;;  %1595 = vmatprep.mubr.msk.bf16.mxu0 %vm2013_vm0, %v2012_v0 }
 0x21a   : > { %1605 = vmatprep.subr.bf16.mxu0 %v2012_v0 }
 0x21c   : > { %1590 = vmatmul.mubr.msk.bf16.vlgmr.msra.gmra.mrb[8].mxu1 %vm788_vm3, %v777_v45 }
 0x21d   : > { %1600 = vmatpush3.bf16.msra.mxu1 %v1018_v44  ;;  %1601 = vmatprep.mubr.msk.bf16.mxu1 %vm2013_vm0, %v2012_v0  ;;  %v1745_v44 = vld [vmem:[#allocation12] sm:$0xff]  }
 0x21e   : > { %1611 = vmatprep.subr.bf16.mxu1 %v2012_v0 }
 0x21f   : > { %v785_v53 = vld [vmem:[#allocation3 + $0x4] sm:$0xf] }
 0x220   : > { %1596 = vmatmul.mubr.msk.bf16.vlgmr.msra.gmra.mrb[12].mxu0 %vm788_vm3, %v779_v46  ;;  %v1064_v54 = vsel %vm1016_vm4, %v785_v53, 0  ;;  %v1746_v46 = vld [vmem:[#allocation12 + $0x8] sm:$0xff]  }
 0x221   : > { %1607 = vmatprep.mubr.msk.bf16.mxu0 %vm2013_vm0, %v2012_v0  ;;  %1606 = vmatpush3.bf16.msra.mxu0 %v1064_v54 }
 0x222   : > { %1617 = vmatprep.subr.bf16.mxu0 %v2012_v0 }
 0x278   : > { %v829_v47 = vpop.f32.mrb[4].mxu1 }
 0x279   : > { %v1579_v48 = vpop.f32.mrb[5].mxu1  ;;  %v973_v49 = vsel %vm788_vm3, %v829_v47, -inf }
 0x27a   : > { %974 = vmax.xlane.f32.xlu0 %v973_v49  ;;  %v832_v50 = vpop.f32.mrb[6].mxu1 }
 0x27b   : > { %v1580_v51 = vpop.f32.mrb[7].mxu1 }
 0x2eb   : > { %v875_v55 = vpop.f32.mrb[8].mxu0 }
 0x2ec   : > { %v1585_v56 = vpop.f32.mrb[9].mxu0  ;;  %v976_v57 = vsel %vm788_vm3, %v875_v55, -inf }
 0x2ed   : > { %977 = vmax.xlane.f32.xlu1 %v976_v57  ;;  %v878_v58 = vpop.f32.mrb[10].mxu0 }
 0x2ee   : > { %v1586_v59 = vpop.f32.mrb[11].mxu0 }
 0x2ef   : > { %v921_v60 = vpop.f32.mrb[8].mxu1 }
 0x2f0   : > { %v1591_v61 = vpop.f32.mrb[9].mxu1  ;;  %v979_v62 = vsel %vm788_vm3, %v921_v60, -inf }
 0x2f1   : > { %980 = vmax.xlane.f32.xlu0 %v979_v62  ;;  %v924_v63 = vpop.f32.mrb[10].mxu1 }
 0x2f2   : > { %v1592_v1 = vpop.f32.mrb[11].mxu1 }
 0x2f3   : > { %v967_v2 = vpop.f32.mrb[12].mxu0 }
 0x2f4   : > { %v1597_v3 = vpop.f32.mrb[13].mxu0  ;;  %v982_v4 = vsel %vm788_vm3, %v967_v2, -inf }
 0x2f5   : > { %983 = vmax.xlane.f32.xlu0 %v982_v4  ;;  %v970_v5 = vpop.f32.mrb[14].mxu0 }
 0x2f6   : > { %v1598_v7 = vpop.f32.mrb[15].mxu0 }
 0x2fe   : > { %698 = vrot.lane.b32.xlu1 %v2409_v31, %s2014_s7 }
 0x307   : > { %v975_v8 = vpop.xlane.xlu0 %974 }
 0x308   : > { %v985_v9 = vsub.f32 %v829_v47, %v975_v8 }
 0x30a   : > { %v989_v10 = vmul.f32 1.442695, %v985_v9 }
 0x30b   : > { %688 = vrot.lane.b32.xlu0 %v2409_v31, %s2016_s17  ;;  %s2586_s17 = sld [smem:[#allocation27_spill]] }
 0x30c   : > { %1747 = vpow2.f32 %v989_v10 }
 0x316   : > { %v1748_v11 = vpop.eup %1747 }
 0x317   : > { %v1009_v12 = vpack.c.bf16 %v1748_v11, %v1748_v11  ;;  %v997_v30 = vsel %vm788_vm3, %v1748_v11, 0.0 }
 0x319   : > { %1602 = vmatmul.mubr.msk.bf16.vlgmr.msra.gmra.mrb[12].mxu1 %vm788_vm3, %v1009_v12 }
 0x31a   : > { %1613 = vmatprep.mubr.msk.bf16.mxu1 %vm2013_vm0, %v2012_v0 }
 0x37a   : > { %v978_v13 = vpop.xlane.xlu1 %977 }
 0x37b   : > { %v986_v14 = vsub.f32 %v875_v55, %v978_v13 }
 0x37d   : > { %v991_v15 = vmul.f32 1.442695, %v986_v14 }
 0x37e   : > { %v981_v16 = vpop.xlane.xlu0 %980  ;;  %v699_v17 = vpop.permute.xlu1 %698 }
 0x37f   : > { %1749 = vpow2.f32 %v991_v15  ;;  %v987_v18 = vsub.f32 %v921_v60, %v981_v16  ;;  %702 = vst.msk [vmem:[#allocation3 + $0xc] sm:$0xf] %vm664_vm2, %v699_v17  ;;  %v1511_v15 = vld [vmem:[%s2583_s11] ss:$0 sm:$0xff]  ;;  %s1909_s11 = scalar_lea.vmem %s2487_s13, 128 }
 0x380   : > { %p1910_p0 = scmp.ne.s32.totalorder %s2487_s13, %s1909_s11  ;;  %p1917_p13 = scmp.lt.s32.totalorder %s1915_s20, %s1909_s11 }
 0x381   : > { %v993_v19 = vmul.f32 1.442695, %v987_v18 }
 0x382   : > { %v984_v20 = vpop.xlane.xlu0 %983  ;;  %p1911_p4 = pnand %p1910_p0, %p2588_p2  ;;  %p1918_p3 = por %p1917_p13, %p1916_p1 }
 0x383   : > { %1751 = vpow2.f32 %v993_v19  ;;  %v988_v21 = vsub.f32 %v967_v2, %v984_v20 }
 0x384   : > { %p1912_p8 = pneg %p1911_p4 }
 0x385   : > { %v995_v22 = vmul.f32 1.442695, %v988_v21 }
 0x386   : > { %v689_v23 = vpop.permute.xlu0 %688  ;;  %v787_v25 = vld [vmem:[#allocation3 + $0xc] sm:$0xf]  ;;  %p1919_p5 = pnand %p1918_p3, %p1912_p8 }
 0x387   : > { %1753 = vpow2.f32 %v995_v22  ;;  %692 = vst.msk [vmem:[#allocation3 + $0x8] sm:$0xf] %vm664_vm2, %v689_v23  ;;  %v1156_v28 = vsel %vm1016_vm4, %v787_v25, 0 }
 0x389   : > { %v1750_v24 = vpop.eup %1749 }
 0x38a   : > { %v1000_v26 = vsel %vm788_vm3, %v1750_v24, 0.0  ;;  %v1010_v27 = vpack.c.bf16 %v1750_v24, %v1750_v24 }
 0x38b   : > { %1001 = vadd.xlane.f32.xlu1 %v1000_v26 }
 0x38c   : > { %1608 = vmatmul.mubr.msk.bf16.vlgmr.msra.gmra.mrb[16].mxu0 %vm788_vm3, %v1010_v27 }
 0x38d   : > { %v1752_v29 = vpop.eup %1751  ;;  %1618 = vmatpush3.bf16.msra.mxu0 %v1156_v28  ;;  %1619 = vmatprep.mubr.msk.bf16.mxu0 %vm2013_vm0, %v2012_v0 }
 0x38e   : > { %v1003_v31 = vsel %vm788_vm3, %v1752_v29, 0.0  ;;  %v786_v32 = vld [vmem:[#allocation3 + $0x8] sm:$0xf]  ;;  %v1011_v35 = vpack.c.bf16 %v1752_v29, %v1752_v29 }
 0x38f   : > { %998 = vadd.xlane.f32.xlu1 %v997_v30  ;;  %1004 = vadd.xlane.f32.xlu0 %v1003_v31  ;;  %v1110_v33 = vsel %vm1016_vm4, %v786_v32, 0 }
 0x390   : > { %1612 = vmatpush3.bf16.msra.mxu1 %v1110_v33  ;;  %v1516_v33 = vld [vmem:[%s2586_s17] ss:$0 sm:$0xff] }
 0x391   : > { %v1754_v34 = vpop.eup %1753  ;;  %1623 = vmatprep.subr.bf16.mxu1 %v2012_v0 }
 0x392   : > { %v1006_v36 = vsel %vm788_vm3, %v1754_v34, 0.0  ;;  %v1012_v37 = vpack.c.bf16 %v1754_v34, %v1754_v34 }
 0x393   : > { %1007 = vadd.xlane.f32.xlu0 %v1006_v36  ;;  %1614 = vmatmul.mubr.msk.bf16.vlgmr.msra.gmra.mrb[16].mxu1 %vm788_vm3, %v1011_v35 }
 0x394   : > { %1620 = vmatmul.mubr.msk.bf16.vlgmr.msra.gmra.mrb[20].mxu0 %vm788_vm3, %v1012_v37  ;;  %1627 = vmatprep.mubr.msk.bf16.mxu1 %vm2013_vm0, %v2012_v0 }
 0x395   : > { %1624 = vmatpush3.bf16.msra.mxu1 %v1745_v44 }
 0x396   : > { %1625 = vmatprep.subr.bf16.mxu1 %v2012_v0 }
 0x399   : > { %1626 = vmatpush3.bf16.msra.mxu1 %v1746_v46 }
 0x3ec   : > { %v1054_v38 = vpop.f32.mrb[12].mxu1 }
 0x3ed   : > { %v1603_v39 = vpop.f32.mrb[13].mxu1 }
 0x3ee   : > { %v1057_v40 = vpop.f32.mrb[14].mxu1 }
 0x3ef   : > { %v1604_v41 = vpop.f32.mrb[15].mxu1 }
 0x418   : > { %v1002_v42 = vpop.xlane.xlu1 %1001 }
 0x419   : > { %1755 = vrcp.f32 %v1002_v42 }
 0x41c   : > { %v1005_v43 = vpop.xlane.xlu0 %1004  ;;  %v999_v4 = vpop.xlane.xlu1 %998 }
 0x41d   : > { %1757 = vrcp.f32 %v1005_v43 }
 0x420   : > { %v1008_v45 = vpop.xlane.xlu0 %1007 }
 0x421   : > { %1759 = vrcp.f32 %v1008_v45 }
 0x422   : > { %1761 = vrcp.f32 %v999_v4 }
 0x423   : > { %v1756_v47 = vpop.eup %1755 }
 0x427   : > { %v1758_v54 = vpop.eup %1757 }
 0x42b   : > { %v1760_v0 = vpop.eup %1759 }
 0x42c   : > { %v1762_v5 = vpop.eup %1761 }
 0x42d   : > { %v1199_v7 = vmul.f32 %v1762_v5, %v1054_v38 }
 0x42f   : > { %v1206_v10 = vpack.c.bf16 %v1199_v7, %v1199_v7 }
 0x45f   : > { %v1100_v48 = vpop.f32.mrb[16].mxu0 }
 0x460   : > { %v1201_v49 = vmul.f32 %v1756_v47, %v1100_v48  ;;  %v1609_v50 = vpop.f32.mrb[17].mxu0 }
 0x461   : > { %v1103_v51 = vpop.f32.mrb[18].mxu0 }
 0x462   : > { %v1207_v52 = vpack.c.bf16 %v1201_v49, %v1201_v49  ;;  %v1610_v53 = vpop.f32.mrb[19].mxu0 }
 0x464   : > { %1211 = vrot.lane.b32.xlu0 %v1207_v52, %s2017_s15 }
 0x466   : > { %v1146_v55 = vpop.f32.mrb[16].mxu1 }
 0x467   : > { %v1203_v56 = vmul.f32 %v1758_v54, %v1146_v55  ;;  %v1615_v57 = vpop.f32.mrb[17].mxu1  ;;  %v1192_v58 = vpop.f32.mrb[20].mxu0 }
 0x468   : > { %v1149_v59 = vpop.f32.mrb[18].mxu1  ;;  %v1621_v60 = vpop.f32.mrb[21].mxu0  ;;  %v1205_v62 = vmul.f32 %v1760_v0, %v1192_v58 }
 0x469   : > { %v1208_v61 = vpack.c.bf16 %v1203_v56, %v1203_v56  ;;  %v1616_v63 = vpop.f32.mrb[19].mxu1  ;;  %v1195_v1 = vpop.f32.mrb[22].mxu0 }
 0x46a   : > { %v1622_v2 = vpop.f32.mrb[23].mxu0  ;;  %v1209_v3 = vpack.c.bf16 %v1205_v62, %v1205_v62 }
 0x46b   : > { %1214 = vrot.lane.b32.xlu1 %v1208_v61, %s2018_s21 }
 0x46f   : > { %1217 = vrot.lane.b32.xlu1 %v1209_v3, %s2019_s27  ;;  %s2587_s27 = sld [smem:[#allocation28_spill]] }
 0x475   : > { %s2485_s29 = scalar_lea.hbm %s2587_s27, %s1518_s12 }
 0x4d6   : > { %v1212_v8 = vpop.permute.xlu0 %1211 }
 0x4d7   : > { %v1221_v11 = vsel %vm788_vm3, %v1206_v10, %v1212_v8 }
 0x4dd   : > { %v1215_v9 = vpop.permute.xlu1 %1214 }
 0x4de   : > { %v1224_v12 = vsel %vm1222_vm5, %v1221_v11, %v1215_v9 }
 0x4e1   : > { %v1218_v13 = vpop.permute.xlu1 %1217 }
 0x4e2   : > { %v1227_v14 = vsel %vm1225_vm6, %v1224_v12, %v1218_v13 }
 0x4e3   : > { %1628 = vmatmul.mubr.msk.bf16.vlgmr.msra.gmra.mrb[20].mxu1 %vm555_vm1, %v1227_v14 }
 0x5b6   : > { %v1287_v16 = vpop.f32.mrb[20].mxu1 }
 0x5b7   : > { %v1288_v17 = vadd.f32 %v1511_v15, %v1287_v16  ;;  %v1629_v18 = vpop.f32.mrb[21].mxu1 }
 0x5b8   : > { %v1290_v19 = vpop.f32.mrb[22].mxu1 }
 0x5b9   : > { %v1630_v20 = vpop.f32.mrb[23].mxu1  ;;  %v1293_v21 = vadd.f32 %v1288_v17, %v2370_v6  ;;  %v1515_v6 = vld [vmem:[%s2585_s28] ss:$0 sm:$0xff] }
 0x5bb   : > { %v1294_v22 = vsel %vm555_vm1, %v1293_v21, 0.0 }
 0x5bc   : > { %1295 = vadd.xlane.f32.xlu0 %v1294_v22 }
 0x649   : > { %v1296_v23 = vpop.xlane.xlu0 %1295 }
 0x64a   : > { %v1298_v24 = vmul.f32 0.03125, %v1296_v23 }
 0x64c   : > { %v1299_v25 = vsub.f32 %v1293_v21, %v1298_v24 }
 0x64e   : > { %v1300_v26 = vmul.f32 %v1299_v25, %v1299_v25 }
 0x650   : > { %v1301_v27 = vsel %vm555_vm1, %v1300_v26, 0.0 }
 0x651   : > { %1302 = vadd.xlane.f32.xlu1 %v1301_v27 }
 0x6de   : > { %v1303_v28 = vpop.xlane.xlu1 %1302 }
 0x6df   : > { %v1304_v29 = vmul.f32 0.03125, %v1303_v28 }
 0x6e1   : > { %v1305_v30 = vadd.f32 1e-05, %v1304_v29 }
 0x6e3   : > { %1763 = vrsqrt.f32 %v1305_v30 }
 0x6ed   : > { %v1764_v31 = vpop.eup %1763 }
 0x6ee   : > { %v1307_v32 = vmul.f32 %v1764_v31, %v1299_v25 }
 0x6f0   : > { %v1315_v34 = vmul.f32 %v1515_v6, %v1307_v32 }
 0x6f2   : > { %v1323_v35 = vadd.f32 %v1516_v33, %v1315_v34 }
 0x6f4   : > { %1324 = vst.msk [vmem:[%s525_s0] sm:$0xff] %vm555_vm1, %v1323_v35 }
 0x6f5   : > { %1922 = shalt.err (!%p1919_p5)
}
 0x6f6   : > { %s1923_s2 = scalar_lea.hbm %s2485_s29, 128  ;;  %s1927_s19 = scalar_lea.hbm %s2587_s27, 256 }
 0x6f7   : > { %p1924_p6 = scmp.ne.s32.totalorder %s2485_s29, %s1923_s2  ;;  %p1928_p12 = scmp.lt.u32.totalorder %s2485_s29, %s2587_s27 }
 0x6f8   : > { %p1929_p11 = scmp.lt.u32.totalorder %s1927_s19, %s1923_s2  ;;  %p1931_p0 = scmp.lt.u32.totalorder %s1923_s2, %s2485_s29 }
 0x6f9   : > { %p1925_p10 = pnand %p1924_p6, %p2588_p2 }
 0x6fa   : > { %p1930_p9 = por %p1929_p11, %p1928_p12 }
 0x6fb   : > { %p1926_p7 = pneg %p1925_p10 }
 0x6fc   : > { %p1932_p4 = por %p1931_p0, %p1930_p9 }
 0x6fe   : > { %p1933_p8 = pnand %p1932_p4, %p1926_p7 }
 0x700   : > { %1936 = shalt.err (!%p1933_p8)
}
 0x701   : > { %1647 = dma.vmem_to_hbm [thread:$0]  (%p2588_p2), %s2487_s13, 128, %s2485_s29, %s1326_s30  }
 0x702 PF: > { %s2589_s12 = sld [smem:[#allocation19_spill]]  ;;  %s2590_s0 = sld [smem:[#allocation21_spill]] }
 0x703   : > { %p2592_p13 = scmp.ge.s32.totalorder %s2003_s26, 2 }
 0x708   : > { %s1352_s15 = sand.u32 1, %s2589_s12   ;;  %p2591_p1 = scmp.ne.s32.totalorder %s2590_s0, 0 }
 0x709   : > { %s1353_s21 = scalar_lea.sflag [#allocation6], %s1352_s15 }
 0x70a   : > { %p1667_p3 = pnand %p2592_p13, %p2591_p1 }
 0x70c   : > { %1978 = dma.done.wait (!%p1667_p3), %s1353_s21, 128  }
 0x70d   : > { %1980 = vsyncadd (!%p1667_p3), %s1353_s21, 4294967168  ;;  %s32_s26 = sadd.s32 1, %s2003_s26   ;;  %s2593_s21 = smov %s1987_s22 }
 0x70e   : > { %p29_p5 = scmp.ge.s32.totalorder %s32_s26, 4   ;;  %s2594_s22 = smov %s1991_s23 }
 0x70f   : > { %s2595_s23 = smov %s2257_s24  ;;  %s2596_s24 = smov %s1999_s25 }
 0x710   : > { %s2597_s25 = smov %s2599_s16  ;;  %31 = sbr.rel (!%p29_p5) target bundleno = 17 (0x11), region = 148 }
 0x717   :  { %1358 = vsyncpa [#allocation5], 1 }
 0x718   :  { %1360 = vsyncpa [#allocation5 + $0x1], 1 }
 0x719   :  { %1361 = vsyncpa [#allocation8], 1 }
 0x71a   :  { %1363 = vsyncpa [#allocation8 + $0x1], 1 }
 0x71b   :  { %1364 = vsyncpa [#allocation11], 1 }
 0x71c   :  { %1365 = vsyncpa [#allocation6], 1 }
 0x71d   :  { %1367 = vsyncpa [#allocation6 + $0x1], 1 }

</bundles_post_ra>
